<compile_context>
chip_gen: v7x
topology: tpu7x:2x2x1
jax: 0.10.0
libtpu: 0.0.40
codegen_flags: <defaults>
</compile_context>

<pallas_src>
import functools

import jax
import jax.numpy as jnp
from jax import lax
from jax.experimental import pallas as pl
from jax.experimental.pallas import tpu as pltpu

_LANES = 128


def _largest_divisor_leq(n: int, limit: int) -> int:
    limit = max(1, min(n, limit))
    for d in range(limit, 0, -1):
        if n % d == 0:
            return d
    return 1


def _vmem_budget():
    """Returns (target bytes per mean/logvar/noise/zout slab per step, vmem limit)."""
    try:
        vmem_cap = pltpu.get_tpu_info().vmem_capacity_bytes
    except Exception:
        vmem_cap = 64 * 1024 * 1024
    if vmem_cap >= 128 * 1024 * 1024:            # v5e / v6e: 128 MiB physical
        return 4 * 1024 * 1024, 64 * 1024 * 1024
    # v7x: 64 MiB physical -> ~16 MiB double-buffered footprint, 40 MiB limit
    return 2 * 1024 * 1024, 40 * 1024 * 1024


def _dg_body(z_ref, noise_ref, zout_ref, klp_ref, *, sample, r_total, r_tile,
             needs_row_mask):
    # z_ref: (Bt, 2, Rt, 128); index-0/1 on the leading size-2 axis is a
    # static offset view (no sublane slicing / relayout).
    mean = z_ref[:, 0].astype(jnp.float32)                   # (Bt, Rt, 128)
    logvar = z_ref[:, 1].astype(jnp.float32)

    if needs_row_mask:
        # Tail tile along the row axis: zero the pad region so its KL
        # contribution is exactly 0 (0.5*(0 + e^0 - 1 - 0) = 0); out-of-bounds
        # output rows are dropped by the pipeline on writeback.
        rows_left = r_total - pl.program_id(1) * r_tile
        row_ids = lax.broadcasted_iota(jnp.int32, mean.shape, 1)
        valid = row_ids < rows_left
        mean = jnp.where(valid, mean, 0.0)
        logvar = jnp.where(valid, logvar, 0.0)

    logvar = jnp.clip(logvar, -30.0, 20.0)
    if sample:
        std = jnp.exp(0.5 * logvar)      # single EUP transcendental per element
        var = std * std
        zout = mean + std * noise_ref[...].astype(jnp.float32)
    else:
        var = jnp.exp(logvar)
        zout = mean
    zout_ref[...] = zout.astype(zout_ref.dtype)

    kl = jnp.square(mean) + var - 1.0 - logvar                # (Bt, Rt, 128)
    kl2 = kl.reshape(-1, kl.shape[-1])                        # merge leading dims
    klp_ref[0, 0] = 0.5 * jnp.sum(kl2, axis=0, keepdims=True)  # (1, 128) lane partial


def _dg_sample_kernel(z_ref, noise_ref, zout_ref, klp_ref, **kw):
    _dg_body(z_ref, noise_ref, zout_ref, klp_ref, sample=True, **kw)


def _dg_mode_kernel(z_ref, zout_ref, klp_ref, **kw):
    _dg_body(z_ref, None, zout_ref, klp_ref, sample=False, **kw)


def diagonal_gaussian_regularizer(z, noise=None, *, sample: bool = True,
                                  max_rows_per_tile: int | None = None):
    """z: (B, 2C, H, W). noise: (B, C, H, W) (required iff sample=True).

    Returns (z_out (B, C, H, W), {'kl_loss': scalar}).
    """
    B, C2, H, W = z.shape
    assert C2 % 2 == 0, "z must carry concatenated (mean, logvar) channels"
    C = C2 // 2
    N = C * H * W
    # TODO(synk): shapes with C*H*W % 128 != 0 would need a lane-padded tail tile.
    assert N % _LANES == 0, "C*H*W must be a multiple of 128 for this kernel"
    R = N // _LANES

    elem_bytes = jnp.dtype(z.dtype).itemsize
    sub_mult = max(8, 32 // elem_bytes)          # 8 f32, 16 bf16, 32 int8/fp8
    target_slab_bytes, vmem_limit = _vmem_budget()
    rows_target = max(sub_mult, target_slab_bytes // (_LANES * elem_bytes))
    if max_rows_per_tile is not None:
        rows_target = max(sub_mult, min(rows_target, max_rows_per_tile))

    if R <= rows_target:
        # Small per-sample slab: take the full sample (Rt = R is layout-legal
        # regardless of sub_mult) and merge batch samples into each grid step.
        Rt = R
        Bt = _largest_divisor_leq(B, rows_target // R)
        needs_row_mask = False
    else:
        Bt = 1
        Rt = (rows_target // sub_mult) * sub_mult
        needs_row_mask = (R % Rt) != 0
    n_t = pl.cdiv(R, Rt)
    n_b = B // Bt

    # v7x megacore: guarantee >= 2 "parallel" grid steps when possible.
    if n_b * n_t == 1:
        if B >= 2:
            Bt = _largest_divisor_leq(B, B // 2)
            n_b = B // Bt
        elif R >= 2 * sub_mult:
            Rt = max(sub_mult, ((R // 2) // sub_mult) * sub_mult)
            n_t = pl.cdiv(R, Rt)
            needs_row_mask = (R % Rt) != 0

    # Pure reshape (no data movement): mean is index 0, logvar index 1 on dim 1.
    z4 = z.reshape(B, 2, R, _LANES)

    z_spec = pl.BlockSpec((Bt, 2, Rt, _LANES), lambda b, t: (b, 0, t, 0))
    zout_spec = pl.BlockSpec((Bt, Rt, _LANES), lambda b, t: (b, t, 0))
    klp_spec = pl.BlockSpec((1, 1, 1, _LANES), lambda b, t: (b, t, 0, 0))

    out_shape = (
        jax.ShapeDtypeStruct((B, R, _LANES), z.dtype),
        jax.ShapeDtypeStruct((n_b, n_t, 1, _LANES), jnp.float32),
    )
    compiler_params = pltpu.CompilerParams(
        dimension_semantics=("parallel", "parallel"),
        vmem_limit_bytes=vmem_limit,
    )
    static = dict(r_total=R, r_tile=Rt, needs_row_mask=needs_row_mask)

    if sample:
        assert noise is not None, "noise is required when sample=True"
        noise3 = noise.reshape(B, R, _LANES)
        noise_spec = pl.BlockSpec((Bt, Rt, _LANES), lambda b, t: (b, t, 0))
        z_out_flat, kl_parts = pl.pallas_call(
            functools.partial(_dg_sample_kernel, **static),
            out_shape=out_shape,
            grid=(n_b, n_t),
            in_specs=[z_spec, noise_spec],
            out_specs=(zout_spec, klp_spec),
            compiler_params=compiler_params,
        )(z4, noise3)
    else:
        # No noise operand at all -> no wasted HBM->VMEM DMA in the mode path.
        z_out_flat, kl_parts = pl.pallas_call(
            functools.partial(_dg_mode_kernel, **static),
            out_shape=out_shape,
            grid=(n_b, n_t),
            in_specs=[z_spec],
            out_specs=(zout_spec, klp_spec),
            compiler_params=compiler_params,
        )(z4)

    z_out = z_out_flat.reshape(B, C, H, W)
    kl_loss = jnp.sum(kl_parts) / B
    return z_out, {"kl_loss": kl_loss}


def _reference(z, noise, sample=True):
    C = z.shape[1] // 2
    mean, logvar = z[:, :C], z[:, C:]
    logvar = jnp.clip(logvar, -30.0, 20.0)
    std = jnp.exp(0.5 * logvar)
    var = jnp.exp(logvar)
    z_out = mean + std * noise if sample else mean
    kl = 0.5 * jnp.sum(jnp.square(mean) + var - 1.0 - logvar, axis=(1, 2, 3))
    kl_loss = jnp.sum(kl) / kl.shape[0]
    return z_out, kl_loss


if __name__ == "__main__":
    key = jax.random.PRNGKey(0)
    k_z, k_n, k_z2, k_n2 = jax.random.split(key, 4)

    # Primary small config: latent C=4 -> z carries 2*C channels.
    B, C, H, W = 2, 4, 16, 16
    z = jax.random.normal(k_z, (B, 2 * C, H, W), dtype=jnp.float32)
    noise = jax.random.normal(k_n, (B, C, H, W), dtype=jnp.float32)

    # sample=True path
    z_out, log_dict = diagonal_gaussian_regularizer(z, noise, sample=True)
    jax.block_until_ready((z_out, log_dict["kl_loss"]))
    z_ref, kl_ref = _reference(z, noise, sample=True)
    assert z_out.shape == (B, C, H, W)
    assert jnp.allclose(z_out, z_ref, atol=1e-5, rtol=1e-5)
    assert jnp.allclose(log_dict["kl_loss"], kl_ref, atol=1e-4, rtol=1e-5)

    # sample=False (mode) path — exercises the noise-free variant.
    z_mode, log_mode = diagonal_gaussian_regularizer(z, sample=False)
    jax.block_until_ready((z_mode, log_mode["kl_loss"]))
    z_ref_m, kl_ref_m = _reference(z, noise, sample=False)
    assert jnp.allclose(z_mode, z_ref_m, atol=1e-5, rtol=1e-5)
    assert jnp.allclose(log_mode["kl_loss"], kl_ref_m, atol=1e-4, rtol=1e-5)

    # Awkward shape exercising the masked row-tail path (R=12, forced Rt=8).
    B2, Cl, H2, W2 = 1, 4, 16, 24
    z2 = jax.random.normal(k_z2, (B2, 2 * Cl, H2, W2), dtype=jnp.float32)
    n2 = jax.random.normal(k_n2, (B2, Cl, H2, W2), dtype=jnp.float32)
    z2_out, log2 = diagonal_gaussian_regularizer(z2, n2, sample=True,
                                                 max_rows_per_tile=8)
    jax.block_until_ready((z2_out, log2["kl_loss"]))
    z2_ref, kl2_ref = _reference(z2, n2, sample=True)
    assert jnp.allclose(z2_out, z2_ref, atol=1e-5, rtol=1e-5)
    assert jnp.allclose(log2["kl_loss"], kl2_ref, atol=1e-4, rtol=1e-5)

    print("KERNEL_OK")
</pallas_src>

<mosaic_0001>
module attributes {stable_mosaic.version = 11 : i64} {
  func.func @_dg_sample_kernel(%arg0: i32, %arg1: i32, %arg2: memref<1x2x8x128xf32, #tpu.memory_space<vmem>>, %arg3: memref<1x8x128xf32, #tpu.memory_space<vmem>>, %arg4: memref<1x8x128xf32, #tpu.memory_space<vmem>>, %arg5: memref<1x1x1x128xf32, #tpu.memory_space<vmem>>) attributes {dimension_semantics = [#tpu.dimension_semantics<parallel>, #tpu.dimension_semantics<parallel>], iteration_bounds = array<i64: 2, 1>, scalar_prefetch = 0 : i64, scratch_operands = 0 : i64, tpu.core_type = #tpu.core_type<tc>, window_params = [{transform_indices = @transform_0, window_bounds = array<i64: 1, 2, 8, 128>}, {transform_indices = @transform_1, window_bounds = array<i64: 1, 8, 128>}, {transform_indices = @transform_2, window_bounds = array<i64: 1, 8, 128>}, {transform_indices = @transform_3, window_bounds = array<i64: 1, 1, 1, 128>}]} {
    %c0 = arith.constant 0 : index
    %c0_0 = arith.constant 0 : index
    %c0_1 = arith.constant 0 : index
    %c0_2 = arith.constant 0 : index
    %0 = vector.load %arg2[%c0, %c0_0, %c0_1, %c0_2] : memref<1x2x8x128xf32, #tpu.memory_space<vmem>>, vector<1x1x8x128xf32>
    %1 = vector.shape_cast %0 : vector<1x1x8x128xf32> to vector<1x8x128xf32>
    %c0_3 = arith.constant 0 : index
    %c1 = arith.constant 1 : index
    %c0_4 = arith.constant 0 : index
    %c0_5 = arith.constant 0 : index
    %2 = vector.load %arg2[%c0_3, %c1, %c0_4, %c0_5] : memref<1x2x8x128xf32, #tpu.memory_space<vmem>>, vector<1x1x8x128xf32>
    %3 = vector.shape_cast %2 : vector<1x1x8x128xf32> to vector<1x8x128xf32>
    %cst = arith.constant -3.000000e+01 : f32
    %cst_6 = arith.constant 2.000000e+01 : f32
    %4 = vector.broadcast %cst : f32 to vector<1x8x128xf32>
    %5 = arith.maximumf %4, %3 : vector<1x8x128xf32>
    %6 = vector.broadcast %cst_6 : f32 to vector<1x8x128xf32>
    %7 = arith.minimumf %6, %5 : vector<1x8x128xf32>
    %cst_7 = arith.constant 5.000000e-01 : f32
    %8 = vector.broadcast %cst_7 : f32 to vector<1x8x128xf32>
    %9 = arith.mulf %8, %7 : vector<1x8x128xf32>
    %10 = math.exp %9 : vector<1x8x128xf32>
    %11 = arith.mulf %10, %10 : vector<1x8x128xf32>
    %c0_8 = arith.constant 0 : index
    %c0_9 = arith.constant 0 : index
    %c0_10 = arith.constant 0 : index
    %12 = vector.load %arg3[%c0_8, %c0_9, %c0_10] : memref<1x8x128xf32, #tpu.memory_space<vmem>>, vector<1x8x128xf32>
    %13 = arith.mulf %10, %12 : vector<1x8x128xf32>
    %14 = arith.addf %1, %13 : vector<1x8x128xf32>
    %c0_11 = arith.constant 0 : index
    %c0_12 = arith.constant 0 : index
    %c0_13 = arith.constant 0 : index
    %15 = vector.load %arg4[%c0_11, %c0_12, %c0_13] : memref<1x8x128xf32, #tpu.memory_space<vmem>>, vector<1x8x128xf32>
    tpu.vector_store %arg4[%c0_11, %c0_12, %c0_13], %14 {strides = array<i32>} : memref<1x8x128xf32, #tpu.memory_space<vmem>>, vector<1x8x128xf32>,
    %16 = arith.mulf %1, %1 : vector<1x8x128xf32>
    %17 = arith.addf %16, %11 : vector<1x8x128xf32>
    %cst_14 = arith.constant 1.000000e+00 : f32
    %18 = vector.broadcast %cst_14 : f32 to vector<1x8x128xf32>
    %19 = arith.subf %17, %18 : vector<1x8x128xf32>
    %20 = arith.subf %19, %7 : vector<1x8x128xf32>
    %21 = vector.shape_cast %20 : vector<1x8x128xf32> to vector<8x128xf32>
    %cst_15 = arith.constant dense<0.000000e+00> : vector<128xf32>
    %22 = vector.multi_reduction <add>, %21, %cst_15 [0] : vector<8x128xf32> to vector<128xf32>
    %23 = vector.shape_cast %22 : vector<128xf32> to vector<1x128xf32>
    %cst_16 = arith.constant 5.000000e-01 : f32
    %24 = vector.broadcast %cst_16 : f32 to vector<1x128xf32>
    %25 = arith.mulf %24, %23 : vector<1x128xf32>
    %c0_17 = arith.constant 0 : index
    %c0_18 = arith.constant 0 : index
    %c0_19 = arith.constant 0 : index
    %c0_20 = arith.constant 0 : index
    %26 = vector.load %arg5[%c0_17, %c0_18, %c0_19, %c0_20] : memref<1x1x1x128xf32, #tpu.memory_space<vmem>>, vector<1x1x1x128xf32>
    %27 = vector.shape_cast %26 : vector<1x1x1x128xf32> to vector<1x128xf32>
    %28 = vector.shape_cast %25 : vector<1x128xf32> to vector<1x1x1x128xf32>
    tpu.vector_store %arg5[%c0_17, %c0_18, %c0_19, %c0_20], %28 {strides = array<i32>} : memref<1x1x1x128xf32, #tpu.memory_space<vmem>>, vector<1x1x1x128xf32>,
    return
  }
  func.func @transform_0(%arg0: i32, %arg1: i32) -> (i32, i32, i32, i32) {
    %c0_i32 = arith.constant 0 : i32
    %c0_i32_0 = arith.constant 0 : i32
    %c0_i32_1 = arith.constant 0 : i32
    return %arg0, %c0_i32, %arg1, %c0_i32_0 : i32, i32, i32, i32
  }
  func.func @transform_1(%arg0: i32, %arg1: i32) -> (i32, i32, i32) {
    %c0_i32 = arith.constant 0 : i32
    %c0_i32_0 = arith.constant 0 : i32
    return %arg0, %arg1, %c0_i32 : i32, i32, i32
  }
  func.func @transform_2(%arg0: i32, %arg1: i32) -> (i32, i32, i32) {
    %c0_i32 = arith.constant 0 : i32
    %c0_i32_0 = arith.constant 0 : i32
    return %arg0, %arg1, %c0_i32 : i32, i32, i32
  }
  func.func @transform_3(%arg0: i32, %arg1: i32) -> (i32, i32, i32, i32) {
    %c0_i32 = arith.constant 0 : i32
    %c0_i32_0 = arith.constant 0 : i32
    %c0_i32_1 = arith.constant 0 : i32
    return %arg0, %arg1, %c0_i32, %c0_i32_0 : i32, i32, i32, i32
  }
}

</mosaic_0001>

<bundles_post_ra>
// kernel: tpu_custom_call.1
= control target key start
LH: loop header
LB: loop body
LE: loop exit
PB: predicated region body
PF: predicated region fallthrough
CT: control target
= control target key end

     0   :  { %9 = vsyncpa [#allocation3], 0  ;;  %s999_s0 = inlined_call_operand.hbm [shape: f32[2,2,8,128], index: 0, kind: input, shape index: {}]   ;;  %s1000_s1 = inlined_call_operand.hbm [shape: f32[2,8,128], index: 1, kind: input, shape index: {}]   ;;  %s1001_s2 = inlined_call_operand.hbm [shape: f32[2,8,128], index: 2, kind: output, shape index: {0}]   ;;  %s1002_s3 = inlined_call_operand.hbm [shape: f32[2,1,1,128], index: 3, kind: output, shape index: {1}]  }
   0x1   :  { %11 = vsyncpa [#allocation3 + $0x1], 0 }
   0x2   :  { %12 = vsyncpa [#allocation6], 0 }
   0x3   :  { %14 = vsyncpa [#allocation6 + $0x1], 0 }
   0x4   :  { %15 = vsyncpa [#allocation4], 0 }
   0x5   :  { %17 = vsyncpa [#allocation4 + $0x1], 0 }
   0x6   :  { %18 = vsyncpa [#allocation9], 0 }
   0x7   :  { %20 = vsyncpa [#allocation9 + $0x1], 0  ;;  %s753_s12 = smov 0   ;;  %s755_s13 = smov 0  }
   0x8   :  { %s757_s14 = smov 0   ;;  %s759_s15 = smov 0  }
   0x9   :  { %s761_s16 = smov 0   ;;  %s763_s17 = smov 0  }
   0xa LB: > { %s450_s18 = sadd.s32 4294967295, %s725_s17   ;;  %s451_s19 = sadd.s32 4294967294, %s725_s17   ;;  %s725_s17 = sphi %s763_s17, %s26_s17   ;;  %s721_s16 = sphi %s761_s16, %s1021_s16   ;;  %s717_s15 = sphi %s759_s15, %s1020_s15   ;;  %s713_s14 = sphi %s757_s14, %s1019_s14   ;;  %s709_s13 = sphi %s755_s13, %s1018_s13   ;;  %s705_s12 = sphi %s753_s12, %s1017_s12  }
   0xb   : > { %s38_s20 = sadd.s32 1, %s721_s16  ;;  %s47_s21 = sadd.s32 1, %s713_s14 }
   0xc   : > { %p40_p0 = scmp.ge.s32.totalorder %s38_s20, 2  ;;  %p54_p1 = scmp.ne.s32.totalorder %s713_s14, %s709_s13 }
   0xd   : > { %p55_p2 = scmp.eq.s32.totalorder %s725_s17, 0  ;;  %p60_p3 = scmp.ne.s32.totalorder %s709_s13, %s705_s12 }
   0xe   : > { %s1023_s20 = smov (%p40_p0, %s38_s20), 0  ;;  %p61_p5 = scmp.eq.s32.totalorder %s450_s18, 0 }
   0xf   : > { %p794_p4 = por %p55_p2, %p54_p1  ;;  %s42_s23 = ssub.s32 %s721_s16, %s1023_s20 }
  0x10   : > { %p114_p6 = scmp.eq.s32.totalorder %s450_s18, 1  ;;  %p45_p7 = scmp.eq.s32.totalorder %s42_s23, 0 }
  0x11   : > { %p800_p8 = por %p61_p5, %p60_p3  ;;  %p120_p10 = scmp.eq.s32.totalorder %s451_s19, 1 }
  0x12   : > { %p804_p9 = por %p114_p6, %p54_p1  ;;  %p493_p13 = scmp.lt.s32.totalorder %s725_s17, 2 }
  0x13   : > { %s1006_s24 = scalar_select %p800_p8, 1, 0 }
  0x14   : > { %s1007_s25 = scalar_select %p804_p9, 1, 0 }
  0x15   : > { %s809_s26 = scalar_select %p45_p7, %s713_s14, %s47_s21  }
  0x16   : > { %p811_p11 = por %p120_p10, %p60_p3  ;;  %s818_s28 = sand.u32 1, %s713_s14  }
  0x17   : > { %s454_s29 = sshll.u32 %s818_s28, 4  ;;  %s470_s30 = sshll.u32 %s721_s16, 8 }
  0x18   : > { %s1008_s27 = scalar_select %p811_p11, 1, 0 }
  0x19   : > { %s825_s6 = scalar_lea.hbm %s999_s0, %s470_s30  ;;  %s172_s7 = scalar_lea.vmem [#allocation2], %s454_s29 }
  0x1a   : > { %s180_s8 = sshll.u32 %s172_s7, 4  ;;  %p831_p0 = pnand %p493_p13, %p794_p4  ;;  %s827_s8 = int_to_ptr.vmem [resolvable:$true] %s180_s8 }
  0x1b   : > { %s169_s10 = scalar_lea.sflag [#allocation3], %s818_s28  ;;  %s547_s11 = scalar_lea.hbm %s825_s6, 256 }
  0x1c   : > { %p548_p2 = scmp.ne.s32.totalorder %s825_s6, %s547_s11  ;;  %p549_p3 = pneg %p831_p0 }
  0x1d   : > { %s552_s21 = scalar_lea.hbm %s999_s0, 512  ;;  %p553_p4 = scmp.lt.u32.totalorder %s825_s6, %s999_s0 }
  0x1e   : > { %p550_p5 = pnand %p549_p3, %p548_p2  ;;  %p554_p7 = scmp.lt.u32.totalorder %s552_s21, %s547_s11 }
  0x1f   : > { %p556_p13 = scmp.lt.u32.totalorder %s547_s11, %s825_s6 }
  0x20   : > { %p551_p6 = pneg %p550_p5  ;;  %p555_p10 = por %p554_p7, %p553_p4 }
  0x22   : > { %p557_p12 = por %p556_p13, %p555_p10 }
  0x24   : > { %p558_p1 = pnand %p557_p12, %p551_p6 }
  0x26   : > { %561 = shalt.err (!%p558_p1)
}
  0x27   : > { %s562_s29 = scalar_lea.vmem %s827_s8, 256  ;;  %s727_s30 = smov [#allocation2]  }
  0x28   : > { %p563_p2 = scmp.ne.s32.totalorder %s827_s8, %s562_s29  ;;  %s567_s4 = sshll.u32 %s727_s30, 4  ;;  %s568_s4 = int_to_ptr.vmem [resolvable:$false] %s567_s4 }
  0x29   : > { %s569_s5 = scalar_lea.vmem %s568_s4, 512  ;;  %p570_p9 = scmp.lt.s32.totalorder %s827_s8, %s568_s4 }
  0x2a   : > { %p565_p5 = pnand %p563_p2, %p549_p3  ;;  %p571_p4 = scmp.lt.s32.totalorder %s569_s5, %s562_s29 }
  0x2c   : > { %p566_p11 = pneg %p565_p5  ;;  %p572_p7 = por %p571_p4, %p570_p9 }
  0x2e   : > { %p573_p10 = pnand %p572_p7, %p566_p11 }
  0x30   : > { %576 = shalt.err (!%p573_p10)
}
  0x31   : > { %s728_s7 = smov 128   ;;  %s729_s11 = smov 8  }
  0x32   : > { %482 = dma.hbm_to_vmem [thread:$0]  (!%p831_p0), %s825_s6, 256, %s827_s8, %s169_s10, %s728_s7, %s728_s7, %s729_s11  }
  0x33   : > { %p207_p12 = scmp.lt.s32.totalorder %s725_s17, 3  ;;  %s457_s18 = sshll.u32 %s818_s28, 3 }
  0x34   : > { %s458_s19 = sshll.u32 %s721_s16, 7  ;;  %p1010_p9 = scmp.ge.s32.totalorder %s725_s17, 1 }
  0x35   : > { %s876_s29 = scalar_lea.hbm %s1000_s1, %s458_s19  ;;  %s194_s30 = scalar_lea.vmem [#allocation5], %s457_s18 }
  0x36   : > { %p869_p11 = pnand %p1010_p9, %p207_p12  ;;  %s202_s4 = sshll.u32 %s194_s30, 4  ;;  %s203_s4 = int_to_ptr.vmem [resolvable:$true] %s202_s4 }
  0x37   : > { %s191_s6 = scalar_lea.sflag [#allocation6], %s818_s28  ;;  %s577_s8 = scalar_lea.hbm %s876_s29, 128 }
  0x38   : > { %s1011_s21 = scalar_select %p869_p11, 1, 0 }
  0x39   : > { %p578_p1 = scmp.ne.s32.totalorder %s876_s29, %s577_s8  ;;  %s582_s7 = scalar_lea.hbm %s1000_s1, 256 }
  0x3a   : > { %p583_p2 = scmp.lt.u32.totalorder %s876_s29, %s1000_s1  ;;  %p584_p5 = scmp.lt.u32.totalorder %s582_s7, %s577_s8 }
  0x3b   : > { %p580_p6 = pnand %p578_p1, %p549_p3  ;;  %p586_p7 = scmp.lt.u32.totalorder %s577_s8, %s876_s29 }
  0x3c   : > { %p585_p4 = por %p584_p5, %p583_p2 }
  0x3d   : > { %p581_p13 = pneg %p580_p6 }
  0x3e   : > { %p587_p10 = por %p586_p7, %p585_p4 }
  0x40   : > { %p588_p12 = pnand %p587_p10, %p581_p13 }
  0x42   : > { %591 = shalt.err (!%p588_p12)
}
  0x43   : > { %s592_s28 = scalar_lea.vmem %s203_s4, 128  ;;  %s730_s18 = smov [#allocation5]  }
  0x44   : > { %p593_p9 = scmp.ne.s32.totalorder %s203_s4, %s592_s28  ;;  %s597_s22 = sshll.u32 %s730_s18, 4  ;;  %s598_s22 = int_to_ptr.vmem [resolvable:$false] %s597_s22 }
  0x45   : > { %s599_s23 = scalar_lea.vmem %s598_s22, 256  ;;  %p600_p8 = scmp.lt.s32.totalorder %s203_s4, %s598_s22 }
  0x46   : > { %p595_p1 = pnand %p593_p9, %p549_p3  ;;  %p601_p11 = scmp.lt.s32.totalorder %s599_s23, %s592_s28 }
  0x48   : > { %p596_p6 = pneg %p595_p1  ;;  %p602_p2 = por %p601_p11, %p600_p8 }
  0x4a   : > { %p603_p5 = pnand %p602_p2, %p596_p6 }
  0x4c   : > { %606 = shalt.err (!%p603_p5)
}
  0x4d   : > { %485 = dma.hbm_to_vmem [thread:$0]  (!%p831_p0), %s876_s29, 128, %s203_s4, %s191_s6  }
  0x4e   : > { %p1012_p13 = scmp.ne.s32.totalorder %s1011_s21, 0 }
  0x4f   : > { %s901_s30 = sand.u32 (!%p1012_p13), 1, %s709_s13   ;;  %p1013_p3 = scmp.ne.s32.totalorder (!%p1012_p13), %s1006_s24, 0 }
  0x50   : > { %211 = sbr.rel (%p1012_p13) target bundleno = 158 (0x9e), region = 28  ;;  %s460_s8 = sshll.u32 (!%p1012_p13), %s901_s30, 4 }
  0x51   : > { %s214_s10 = scalar_lea.sflag (!%p1012_p13), [#allocation3], %s901_s30  ;;  %s217_s5 = scalar_lea.vmem (!%p1012_p13), [#allocation2], %s460_s8 }
  0x57   : > { %688 = dma.done.wait (%p1013_p3), %s214_s10, 256  }
  0x58   : > { %690 = vsyncadd (%p1013_p3), %s214_s10, 4294967040  ;;  %s461_s9 = sshll.u32 %s901_s30, 3  ;;  %s223_s21 = scalar_lea.sflag [#allocation6], %s901_s30 }
  0x59   : > { %s226_s29 = scalar_lea.vmem [#allocation5], %s461_s9 }
  0x5a   : > { %692 = dma.done.wait (%p1013_p3), %s223_s21, 128  }
  0x5b   : > { %694 = vsyncadd (%p1013_p3), %s223_s21, 4294967168  ;;  %v463_v0 = vld [vmem:[%s217_s5 + $0x8] sm:$0xff]  ;;  %v258_v5 = vld [vmem:[%s217_s5] sm:$0xff]  ;;  %s251_s4 = scalar_lea.vmem [#allocation7], %s461_s9  ;;  %s466_s7 = sshll.u32 %s717_s15, 7 }
  0x5c   : > { %v261_v1 = vmax.f32 %v463_v0, -30.0  ;;  %v267_v6 = vld [vmem:[%s226_s29] sm:$0xff]  ;;  %v271_v7 = vmul.f32 %v258_v5, %v258_v5  ;;  %s302_s6 = sshll.u32 %s251_s4, 4  ;;  %s921_s19 = scalar_lea.hbm %s1001_s2, %s466_s7  ;;  %s916_s6 = int_to_ptr.vmem [resolvable:$true] %s302_s6 }
  0x5d   : > { %s284_s28 = scalar_lea.sflag [#allocation4], %s901_s30  ;;  %s607_s18 = scalar_lea.vmem %s916_s6, 128 }
  0x5e   : > { %v262_v2 = vmin.f32 %v261_v1, 20.0  ;;  %p608_p8 = scmp.ne.s32.totalorder %s916_s6, %s607_s18  ;;  %p1014_p0 = scmp.ne.s32.totalorder %s1007_s25, 0 }
  0x5f   : > { %s731_s22 = smov [#allocation7]  }
  0x60   : > { %v263_v3 = vmul.f32 0.5, %v262_v2  ;;  %p609_p11 = pnand %p608_p8, %p1014_p0  ;;  %s611_s23 = sshll.u32 %s731_s22, 4  ;;  %s612_s23 = int_to_ptr.vmem [resolvable:$false] %s611_s23 }
  0x61   : > { %s613_s8 = scalar_lea.vmem %s612_s23, 256  ;;  %p614_p7 = scmp.lt.s32.totalorder %s916_s6, %s612_s23 }
  0x62   : > { %v264_v4 = vmul.f32 1.442695, %v263_v3  ;;  %p610_p4 = pneg %p609_p11  ;;  %p615_p10 = scmp.lt.s32.totalorder %s613_s8, %s607_s18 }
  0x64   : > { %545 = vpow2.f32 %v264_v4  ;;  %p616_p12 = por %p615_p10, %p614_p7 }
  0x66   : > { %p617_p9 = pnand %p616_p12, %p610_p4 }
  0x6e   : > { %v546_v8 = vpop.eup %545 }
  0x6f   : > { %v266_v9 = vmul.f32 %v546_v8, %v546_v8  ;;  %v268_v10 = vmul.f32 %v546_v8, %v267_v6 }
  0x71   : > { %v269_v11 = vadd.f32 %v268_v10, %v258_v5  ;;  %v272_v12 = vadd.f32 %v271_v7, %v266_v9 }
  0x73   : > { %270 = vst [vmem:[%s251_s4] sm:$0xff] %v269_v11  ;;  %v464_v13 = vadd.f32 -1.0, %v272_v12 }
  0x74   : > { %620 = shalt.err (!%p617_p9)
}
  0x75   : > { %s621_s10 = scalar_lea.hbm %s921_s19, 128  ;;  %s625_s21 = scalar_lea.hbm %s1001_s2, 256 }
  0x76   : > { %p622_p1 = scmp.ne.s32.totalorder %s921_s19, %s621_s10  ;;  %p626_p5 = scmp.lt.u32.totalorder %s921_s19, %s1001_s2 }
  0x77   : > { %p627_p13 = scmp.lt.u32.totalorder %s625_s21, %s621_s10  ;;  %p629_p8 = scmp.lt.u32.totalorder %s621_s10, %s921_s19 }
  0x78   : > { %p623_p6 = pnand %p622_p1, %p1014_p0 }
  0x79   : > { %p628_p3 = por %p627_p13, %p626_p5 }
  0x7a   : > { %p624_p2 = pneg %p623_p6 }
  0x7b   : > { %p630_p11 = por %p629_p8, %p628_p3 }
  0x7d   : > { %p631_p4 = pnand %p630_p11, %p624_p2 }
  0x7f   : > { %634 = shalt.err (!%p631_p4)
}
  0x80   : > { %475 = dma.vmem_to_hbm [thread:$0]  (%p1014_p0), %s916_s6, 128, %s921_s19, %s284_s28   ;;  %v274_v14 = vsub.f32 %v464_v13, %v262_v2 }
  0x81   : > { %s257_s7 = scalar_lea.vmem [#allocation8], %s901_s30  ;;  %s467_s11 = sshll.u32 %s717_s15, 4 }
  0x82   : > { %v275_v15 = vrot.slane %v274_v14, 4  ;;  %s316_s24 = sshll.u32 %s257_s7, 4  ;;  %s952_s6 = scalar_lea.hbm %s1002_s3, %s467_s11  ;;  %s947_s24 = int_to_ptr.vmem [resolvable:$true] %s316_s24 }
  0x83   : > { %s289_s19 = scalar_lea.sflag [#allocation9], %s901_s30  ;;  %s635_s28 = scalar_lea.vmem %s947_s24, 16 }
  0x84   : > { %v276_v16 = vadd.f32 %v275_v15, %v274_v14  ;;  %p636_p7 = scmp.ne.s32.totalorder %s947_s24, %s635_s28  ;;  %s732_s15 = smov [#allocation8]  }
  0x85   : > { %s639_s23 = sshll.u32 %s732_s15, 4  ;;  %s640_s23 = int_to_ptr.vmem [resolvable:$false] %s639_s23 }
  0x86   : > { %v277_v17 = vrot.slane %v276_v16, 2  ;;  %p637_p10 = pnand %p636_p7, %p1014_p0  ;;  %s641_s8 = scalar_lea.vmem %s640_s23, 32 }
  0x87   : > { %p642_p9 = scmp.lt.s32.totalorder %s947_s24, %s640_s23  ;;  %p643_p1 = scmp.lt.s32.totalorder %s641_s8, %s635_s28 }
  0x88   : > { %v278_v18 = vadd.f32 %v277_v17, %v276_v16  ;;  %p638_p12 = pneg %p637_p10 }
  0x89   : > { %p644_p6 = por %p643_p1, %p642_p9 }
  0x8a   : > { %v279_v19 = vrot.slane %v278_v18, 1 }
  0x8b   : > { %p645_p2 = pnand %p644_p6, %p638_p12 }
  0x8c   : > { %v280_v20 = vadd.f32 %v279_v19, %v278_v18 }
  0x8e   : > { %v281_v21 = vmul.f32 0.5, %v280_v20 }
  0x90   : > { %282 = vst [vmem:[%s257_s7] sm:$0x1] %v281_v21 }
  0x91   : > { %648 = shalt.err (!%p645_p2)
}
  0x92   : > { %s649_s30 = scalar_lea.hbm %s952_s6, 16  ;;  %s653_s9 = scalar_lea.hbm %s1002_s3, 32 }
  0x93   : > { %p650_p5 = scmp.ne.s32.totalorder %s952_s6, %s649_s30  ;;  %p654_p8 = scmp.lt.u32.totalorder %s952_s6, %s1002_s3 }
  0x94   : > { %p655_p11 = scmp.lt.u32.totalorder %s653_s9, %s649_s30  ;;  %p657_p7 = scmp.lt.u32.totalorder %s649_s30, %s952_s6 }
  0x95   : > { %p651_p13 = pnand %p650_p5, %p1014_p0 }
  0x96   : > { %p656_p4 = por %p655_p11, %p654_p8 }
  0x97   : > { %p652_p3 = pneg %p651_p13 }
  0x98   : > { %p658_p10 = por %p657_p7, %p656_p4 }
  0x9a   : > { %p659_p12 = pnand %p658_p10, %p652_p3 }
  0x9c   : > { %662 = shalt.err (!%p659_p12)
}
  0x9d   : > { %476 = dma.vmem_to_hbm [thread:$0]  (%p1014_p0), %s947_s24, 16, %s952_s6, %s289_s19  }
  0x9e PF: > { %s328_s4 = sand.u32 1, %s705_s12   ;;  %p1015_p9 = scmp.ne.s32.totalorder %s1008_s27, 0 }
  0x9f   : > { %p1016_p1 = scmp.ge.s32.totalorder %s725_s17, 2  ;;  %s329_s7 = scalar_lea.sflag [#allocation4], %s328_s4 }
  0xa1   : > { %p487_p6 = pnand %p1016_p1, %p1015_p9 }
  0xa3   : > { %696 = dma.done.wait (!%p487_p6), %s329_s7, 128  }
  0xa4   : > { %698 = vsyncadd (!%p487_p6), %s329_s7, 4294967168  ;;  %s338_s11 = scalar_lea.sflag [#allocation9], %s328_s4 }
  0xa5   : > { %700 = dma.done.wait (!%p487_p6), %s338_s11, 16  }
  0xa6   : > { %702 = vsyncadd (!%p487_p6), %s338_s11, 4294967280  ;;  %s26_s17 = sadd.s32 1, %s725_s17   ;;  %s1017_s12 = smov %s709_s13 }
  0xa7   : > { %p23_p2 = scmp.ge.s32.totalorder %s26_s17, 4   ;;  %s1018_s13 = smov %s713_s14 }
  0xa8   : > { %s1019_s14 = smov %s809_s26  ;;  %s1020_s15 = smov %s721_s16 }
  0xa9   : > { %s1021_s16 = smov %s1023_s20  ;;  %25 = sbr.rel (!%p23_p2) target bundleno = 10 (0xa), region = 104 }
  0xb0   :  { %342 = vsyncpa [#allocation3], 1 }
  0xb1   :  { %344 = vsyncpa [#allocation3 + $0x1], 1 }
  0xb2   :  { %345 = vsyncpa [#allocation6], 1 }
  0xb3   :  { %347 = vsyncpa [#allocation6 + $0x1], 1 }
  0xb4   :  { %348 = vsyncpa [#allocation4], 1 }
  0xb5   :  { %350 = vsyncpa [#allocation4 + $0x1], 1 }
  0xb6   :  { %351 = vsyncpa [#allocation9], 1 }
  0xb7   :  { %353 = vsyncpa [#allocation9 + $0x1], 1 }

</bundles_post_ra>
